<compile_context>
chip_gen: v7x
topology: tpu7x:2x2x1
jax: 0.10.0
libtpu: 0.0.40
codegen_flags: <defaults>
</compile_context>

<pallas_src>
import jax
import jax.numpy as jnp
from jax.experimental import pallas as pl
from jax.experimental.pallas import tpu as pltpu


def _silu(x):
    # Exact SiLU: x * sigmoid(x). exp sits on the EUP slot; full-precision
    # reciprocal (approx=False) keeps numerics tight — not on the critical
    # slot for this memory-bound head.
    return x * pl.reciprocal(1.0 + jnp.exp(-x), approx=False)


def _head_kernel(x_ref, t_ref, w1_ref, wt1_ref, b1_ref, w2_ref, b2_ref,
                 w3t_ref, b3t_ref, out_ref):
    """Fused 3-layer MLP score head over one row tile.

    x_ref   : [TM, F]  raw node features (f32; cast to bf16 in-register)
    t_ref   : [TM, 1]  diffusion times (f32)
    w1_ref  : [F, H]   bf16
    wt1_ref : [1, H]   f32   time -> hidden weight (VPU broadcast term)
    b1_ref  : [1, H]   f32
    w2_ref  : [H, H]   bf16
    b2_ref  : [1, H]   f32
    w3t_ref : [S, H]   bf16  output weight, transposed
    b3t_ref : [S, 1]   f32
    out_ref : [S, TM]  transposed output tile (lane-dense stores)
    """
    # Layer 1: MXU matmul on bf16 operands, f32 accumulation. The time
    # contribution is a cheap broadcast multiply (no extra matmul / DMA).
    x_bf = x_ref[...].astype(jnp.bfloat16)
    h1 = jnp.dot(x_bf, w1_ref[...], preferred_element_type=jnp.float32)
    h1 = _silu(h1 + t_ref[...] * wt1_ref[...] + b1_ref[...])

    # Layer 2.
    h2 = jnp.dot(h1.astype(jnp.bfloat16), w2_ref[...],
                 preferred_element_type=jnp.float32)
    h2 = _silu(h2 + b2_ref[...])

    # Output layer, computed transposed: out_t[s, m] = sum_h w3t[s,h] * h2[m,h]
    # (rhs-transposed contraction; no explicit transpose of h2 materialized).
    out_t = jax.lax.dot_general(
        w3t_ref[...], h2.astype(jnp.bfloat16),
        dimension_numbers=(((1,), (1,)), ((), ())),
        preferred_element_type=jnp.float32)
    out_ref[...] = (out_t + b3t_ref[...]).astype(out_ref.dtype)


def _round_up(v, m):
    return ((v + m - 1) // m) * m


def mace_score_prediction_head(flat_node_features, flat_times, params, *,
                               tm=2048):
    """Pallas wrapper: tiles over the flattened (batch*atoms) row dimension."""
    n_rows, n_feat = flat_node_features.shape
    w1, wt1, b1, w2, b2, w3, b3 = params
    hidden = w1.shape[1]
    spatial = w3.shape[1]
    out_dtype = flat_node_features.dtype

    # Tiny parameter tensors: cast matmul operands to bf16 once; biases and the
    # time weight stay f32 (bias add / SiLU run in f32 on every chip).
    w1_b = w1.astype(jnp.bfloat16)                         # [F, H]
    w2_b = w2.astype(jnp.bfloat16)                         # [H, H]
    w3t_b = w3.T.astype(jnp.bfloat16)                      # [S, H]
    wt1_f = wt1.reshape(1, hidden).astype(jnp.float32)     # [1, H]
    b1_f = b1.reshape(1, hidden).astype(jnp.float32)
    b2_f = b2.reshape(1, hidden).astype(jnp.float32)
    b3t_f = b3.reshape(spatial, 1).astype(jnp.float32)     # [S, 1]

    # Dominant inputs are passed untouched (no concat / cast / full-array pad:
    # x is read from HBM exactly once, by the kernel).
    x = flat_node_features
    t = flat_times.astype(jnp.float32)

    # Row tile: multiple of 128 (lane-dense transposed stores). Default 2048
    # amortizes per-grid-step overhead; cap so the parallel row grid keeps
    # >= ~4 steps (keeps both v7x TensorCores busy); floor at 128.
    tm_req = max(128, _round_up(int(tm), 128))
    tm_cap = max(128, _round_up(pl.cdiv(max(n_rows, 1), 4), 128))
    tm = min(tm_req, tm_cap)

    # Only inputs smaller than one tile get padded (tiny copy). Otherwise the
    # grid ceil-divides and Pallas masks the partial last block — no extra
    # HBM round trip for remainder rows.
    n_eff = n_rows
    if n_rows < tm:
        n_eff = tm
        x = jnp.pad(x, ((0, n_eff - n_rows), (0, 0)))
        t = jnp.pad(t, ((0, n_eff - n_rows), (0, 0)))

    grid = (pl.cdiv(n_eff, tm),)

    def full2d(r, c):
        return pl.BlockSpec((r, c), lambda i: (0, 0))

    out_t = pl.pallas_call(
        _head_kernel,
        out_shape=jax.ShapeDtypeStruct((spatial, n_eff), out_dtype),
        grid_spec=pltpu.PrefetchScalarGridSpec(
            num_scalar_prefetch=0,
            grid=grid,
            in_specs=[
                pl.BlockSpec((tm, n_feat), lambda i: (i, 0)),   # x  (f32)
                pl.BlockSpec((tm, 1), lambda i: (i, 0)),        # t  (f32)
                full2d(n_feat, hidden),                         # W1   (bf16)
                full2d(1, hidden),                              # Wt1  (f32)
                full2d(1, hidden),                              # b1   (f32)
                full2d(hidden, hidden),                         # W2   (bf16)
                full2d(1, hidden),                              # b2   (f32)
                full2d(spatial, hidden),                        # W3^T (bf16)
                full2d(spatial, 1),                             # b3^T (f32)
            ],
            out_specs=pl.BlockSpec((spatial, tm), lambda i: (0, i)),
        ),
        compiler_params=pltpu.CompilerParams(
            dimension_semantics=("parallel",)),
    )(x, t, w1_b, wt1_f, b1_f, w2_b, b2_f, w3t_b, b3t_f)

    # Module contract returns [N, S]; the small un-transpose lives wrapper-side.
    # (If a downstream consumer can take [S, N] directly, return out_t[:, :n_rows].)
    return out_t.T[:n_rows]


def reference_head(flat_node_features, flat_times, params):
    """Pure-JAX f32 reference of the same forward pass."""
    w1, wt1, b1, w2, b2, w3, b3 = params
    h1 = jax.nn.silu(flat_node_features @ w1 + flat_times @ wt1 + b1)
    h2 = jax.nn.silu(h1 @ w2 + b2)
    return h2 @ w3 + b3


def make_params(key, n_feat, hidden, spatial):
    """Deterministic synthetic parameters (no checkpoint loading)."""
    ks = jax.random.split(key, 7)
    w1 = jax.random.normal(ks[0], (n_feat, hidden), jnp.float32) / jnp.sqrt(n_feat + 1.0)
    wt1 = jax.random.normal(ks[1], (1, hidden), jnp.float32) / jnp.sqrt(n_feat + 1.0)
    b1 = 0.1 * jax.random.normal(ks[2], (1, hidden), jnp.float32)
    w2 = jax.random.normal(ks[3], (hidden, hidden), jnp.float32) / jnp.sqrt(hidden * 1.0)
    b2 = 0.1 * jax.random.normal(ks[4], (1, hidden), jnp.float32)
    w3 = jax.random.normal(ks[5], (hidden, spatial), jnp.float32) / jnp.sqrt(hidden * 1.0)
    b3 = 0.1 * jax.random.normal(ks[6], (1, spatial), jnp.float32)
    return (w1, wt1, b1, w2, b2, w3, b3)


if __name__ == "__main__":
    # TODO(synk): the PyTorch base-class forward is abstract; the standard MLP
    # realization (2 hidden SiLU layers -> spatial_dimension outputs) is used.
    n_feat, hidden, spatial = 32, 64, 3

    key = jax.random.PRNGKey(0)
    k_p, k_rest = jax.random.split(key)
    params = make_params(k_p, n_feat, hidden, spatial)

    # Case 1: batch=2, atoms=8  -> 16 rows  (tiny-input pad-to-one-tile path)
    # Case 2: batch=5, atoms=60 -> 300 rows (multi-tile, partial last block, no pad)
    for n_rows in (2 * 8, 5 * 60):
        k_x, k_t, k_rest = jax.random.split(k_rest, 3)
        flat_node_features = jax.random.normal(k_x, (n_rows, n_feat), jnp.float32)
        flat_times = jax.random.uniform(k_t, (n_rows, 1), jnp.float32)

        out = mace_score_prediction_head(flat_node_features, flat_times, params)
        out = jax.block_until_ready(out)

        ref = reference_head(flat_node_features, flat_times, params)
        assert out.shape == (n_rows, spatial)
        # bf16 matmul operands vs exact-f32 reference -> moderate tolerance.
        max_err = float(jnp.max(jnp.abs(out - ref)))
        assert jnp.allclose(out, ref, atol=5e-2, rtol=5e-2), (
            f"n_rows={n_rows}: mismatch vs JAX reference (max abs err {max_err})")

    print("KERNEL_OK")
</pallas_src>

<mosaic_0001>
module attributes {stable_mosaic.version = 11 : i64} {
  func.func @_head_kernel(%arg0: i32, %arg1: memref<128x32xf32, #tpu.memory_space<vmem>>, %arg2: memref<128x1xf32, #tpu.memory_space<vmem>>, %arg3: memref<32x64xbf16, #tpu.memory_space<vmem>>, %arg4: memref<1x64xf32, #tpu.memory_space<vmem>>, %arg5: memref<1x64xf32, #tpu.memory_space<vmem>>, %arg6: memref<64x64xbf16, #tpu.memory_space<vmem>>, %arg7: memref<1x64xf32, #tpu.memory_space<vmem>>, %arg8: memref<3x64xbf16, #tpu.memory_space<vmem>>, %arg9: memref<3x1xf32, #tpu.memory_space<vmem>>, %arg10: memref<3x128xf32, #tpu.memory_space<vmem>>) attributes {dimension_semantics = [#tpu.dimension_semantics<parallel>], iteration_bounds = array<i64: 1>, scalar_prefetch = 0 : i64, scratch_operands = 0 : i64, tpu.core_type = #tpu.core_type<tc>, window_params = [{transform_indices = @transform_0, window_bounds = array<i64: 128, 32>}, {transform_indices = @transform_1, window_bounds = array<i64: 128, 1>}, {pipeline_mode = #tpu.pipeline_mode<synchronous>, transform_indices = @transform_2, window_bounds = array<i64: 32, 64>}, {pipeline_mode = #tpu.pipeline_mode<synchronous>, transform_indices = @transform_3, window_bounds = array<i64: 1, 64>}, {pipeline_mode = #tpu.pipeline_mode<synchronous>, transform_indices = @transform_4, window_bounds = array<i64: 1, 64>}, {pipeline_mode = #tpu.pipeline_mode<synchronous>, transform_indices = @transform_5, window_bounds = array<i64: 64, 64>}, {pipeline_mode = #tpu.pipeline_mode<synchronous>, transform_indices = @transform_6, window_bounds = array<i64: 1, 64>}, {pipeline_mode = #tpu.pipeline_mode<synchronous>, transform_indices = @transform_7, window_bounds = array<i64: 3, 64>}, {pipeline_mode = #tpu.pipeline_mode<synchronous>, transform_indices = @transform_8, window_bounds = array<i64: 3, 1>}, {transform_indices = @transform_9, window_bounds = array<i64: 3, 128>}]} {
    %c0 = arith.constant 0 : index
    %c0_0 = arith.constant 0 : index
    %0 = vector.load %arg1[%c0, %c0_0] : memref<128x32xf32, #tpu.memory_space<vmem>>, vector<128x32xf32>
    %1 = arith.truncf %0 : vector<128x32xf32> to vector<128x32xbf16>
    %c0_1 = arith.constant 0 : index
    %c0_2 = arith.constant 0 : index
    %2 = vector.load %arg3[%c0_1, %c0_2] : memref<32x64xbf16, #tpu.memory_space<vmem>>, vector<32x64xbf16>
    %cst = arith.constant dense<0.000000e+00> : vector<128x64xf32>
    %3 = tpu.matmul %1, %2, %cst {dimension_numbers = #tpu.dot_dimension_numbers<[1], [0], [0], [1], [0, 0, 1, 1], [], []>} : vector<128x32xbf16>, vector<32x64xbf16>, vector<128x64xf32> -> vector<128x64xf32>
    %c0_3 = arith.constant 0 : index
    %c0_4 = arith.constant 0 : index
    %4 = vector.load %arg2[%c0_3, %c0_4] : memref<128x1xf32, #tpu.memory_space<vmem>>, vector<128x1xf32>
    %c0_5 = arith.constant 0 : index
    %c0_6 = arith.constant 0 : index
    %5 = vector.load %arg4[%c0_5, %c0_6] : memref<1x64xf32, #tpu.memory_space<vmem>>, vector<1x64xf32>
    %6 = vector.broadcast %4 : vector<128x1xf32> to vector<128x64xf32>
    %7 = vector.broadcast %5 : vector<1x64xf32> to vector<128x64xf32>
    %8 = arith.mulf %6, %7 : vector<128x64xf32>
    %9 = arith.addf %3, %8 : vector<128x64xf32>
    %c0_7 = arith.constant 0 : index
    %c0_8 = arith.constant 0 : index
    %10 = vector.load %arg5[%c0_7, %c0_8] : memref<1x64xf32, #tpu.memory_space<vmem>>, vector<1x64xf32>
    %11 = vector.broadcast %10 : vector<1x64xf32> to vector<128x64xf32>
    %12 = arith.addf %9, %11 : vector<128x64xf32>
    %cst_9 = arith.constant 0.000000e+00 : f32
    %13 = vector.broadcast %cst_9 : f32 to vector<128x64xf32>
    %14 = arith.subf %13, %12 : vector<128x64xf32>
    %15 = math.exp %14 : vector<128x64xf32>
    %cst_10 = arith.constant 1.000000e+00 : f32
    %16 = vector.broadcast %cst_10 : f32 to vector<128x64xf32>
    %17 = arith.addf %16, %15 : vector<128x64xf32>
    %18 = tpu.reciprocal %17 : vector<128x64xf32> -> vector<128x64xf32>
    %19 = arith.mulf %12, %18 : vector<128x64xf32>
    %20 = arith.truncf %19 : vector<128x64xf32> to vector<128x64xbf16>
    %c0_11 = arith.constant 0 : index
    %c0_12 = arith.constant 0 : index
    %21 = vector.load %arg6[%c0_11, %c0_12] : memref<64x64xbf16, #tpu.memory_space<vmem>>, vector<64x64xbf16>
    %cst_13 = arith.constant dense<0.000000e+00> : vector<128x64xf32>
    %22 = tpu.matmul %20, %21, %cst_13 {dimension_numbers = #tpu.dot_dimension_numbers<[1], [0], [0], [1], [0, 0, 1, 1], [], []>} : vector<128x64xbf16>, vector<64x64xbf16>, vector<128x64xf32> -> vector<128x64xf32>
    %c0_14 = arith.constant 0 : index
    %c0_15 = arith.constant 0 : index
    %23 = vector.load %arg7[%c0_14, %c0_15] : memref<1x64xf32, #tpu.memory_space<vmem>>, vector<1x64xf32>
    %24 = vector.broadcast %23 : vector<1x64xf32> to vector<128x64xf32>
    %25 = arith.addf %22, %24 : vector<128x64xf32>
    %cst_16 = arith.constant 0.000000e+00 : f32
    %26 = vector.broadcast %cst_16 : f32 to vector<128x64xf32>
    %27 = arith.subf %26, %25 : vector<128x64xf32>
    %28 = math.exp %27 : vector<128x64xf32>
    %cst_17 = arith.constant 1.000000e+00 : f32
    %29 = vector.broadcast %cst_17 : f32 to vector<128x64xf32>
    %30 = arith.addf %29, %28 : vector<128x64xf32>
    %31 = tpu.reciprocal %30 : vector<128x64xf32> -> vector<128x64xf32>
    %32 = arith.mulf %25, %31 : vector<128x64xf32>
    %c0_18 = arith.constant 0 : index
    %c0_19 = arith.constant 0 : index
    %33 = vector.load %arg8[%c0_18, %c0_19] : memref<3x64xbf16, #tpu.memory_space<vmem>>, vector<3x64xbf16>
    %34 = arith.truncf %32 : vector<128x64xf32> to vector<128x64xbf16>
    %cst_20 = arith.constant dense<0.000000e+00> : vector<3x128xf32>
    %35 = tpu.matmul %33, %34, %cst_20 {dimension_numbers = #tpu.dot_dimension_numbers<[1], [1], [0], [0], [0, 0, 1, 0], [], []>} : vector<3x64xbf16>, vector<128x64xbf16>, vector<3x128xf32> -> vector<3x128xf32>
    %c0_21 = arith.constant 0 : index
    %c0_22 = arith.constant 0 : index
    %36 = vector.load %arg9[%c0_21, %c0_22] : memref<3x1xf32, #tpu.memory_space<vmem>>, vector<3x1xf32>
    %37 = vector.broadcast %36 : vector<3x1xf32> to vector<3x128xf32>
    %38 = arith.addf %35, %37 : vector<3x128xf32>
    %c0_23 = arith.constant 0 : index
    %c0_24 = arith.constant 0 : index
    %39 = vector.load %arg10[%c0_23, %c0_24] : memref<3x128xf32, #tpu.memory_space<vmem>>, vector<3x128xf32>
    tpu.vector_store %arg10[%c0_23, %c0_24], %38 {strides = array<i32>} : memref<3x128xf32, #tpu.memory_space<vmem>>, vector<3x128xf32>,
    return
  }
  func.func @transform_0(%arg0: i32) -> (i32, i32) {
    %c0_i32 = arith.constant 0 : i32
    %c0_i32_0 = arith.constant 0 : i32
    return %arg0, %c0_i32 : i32, i32
  }
  func.func @transform_1(%arg0: i32) -> (i32, i32) {
    %c0_i32 = arith.constant 0 : i32
    %c0_i32_0 = arith.constant 0 : i32
    return %arg0, %c0_i32 : i32, i32
  }
  func.func @transform_2(%arg0: i32) -> (i32, i32) {
    %c0_i32 = arith.constant 0 : i32
    %c0_i32_0 = arith.constant 0 : i32
    %c0_i32_1 = arith.constant 0 : i32
    return %c0_i32, %c0_i32_0 : i32, i32
  }
  func.func @transform_3(%arg0: i32) -> (i32, i32) {
    %c0_i32 = arith.constant 0 : i32
    %c0_i32_0 = arith.constant 0 : i32
    %c0_i32_1 = arith.constant 0 : i32
    return %c0_i32, %c0_i32_0 : i32, i32
  }
  func.func @transform_4(%arg0: i32) -> (i32, i32) {
    %c0_i32 = arith.constant 0 : i32
    %c0_i32_0 = arith.constant 0 : i32
    %c0_i32_1 = arith.constant 0 : i32
    return %c0_i32, %c0_i32_0 : i32, i32
  }
  func.func @transform_5(%arg0: i32) -> (i32, i32) {
    %c0_i32 = arith.constant 0 : i32
    %c0_i32_0 = arith.constant 0 : i32
    %c0_i32_1 = arith.constant 0 : i32
    return %c0_i32, %c0_i32_0 : i32, i32
  }
  func.func @transform_6(%arg0: i32) -> (i32, i32) {
    %c0_i32 = arith.constant 0 : i32
    %c0_i32_0 = arith.constant 0 : i32
    %c0_i32_1 = arith.constant 0 : i32
    return %c0_i32, %c0_i32_0 : i32, i32
  }
  func.func @transform_7(%arg0: i32) -> (i32, i32) {
    %c0_i32 = arith.constant 0 : i32
    %c0_i32_0 = arith.constant 0 : i32
    %c0_i32_1 = arith.constant 0 : i32
    return %c0_i32, %c0_i32_0 : i32, i32
  }
  func.func @transform_8(%arg0: i32) -> (i32, i32) {
    %c0_i32 = arith.constant 0 : i32
    %c0_i32_0 = arith.constant 0 : i32
    %c0_i32_1 = arith.constant 0 : i32
    return %c0_i32, %c0_i32_0 : i32, i32
  }
  func.func @transform_9(%arg0: i32) -> (i32, i32) {
    %c0_i32 = arith.constant 0 : i32
    %c0_i32_0 = arith.constant 0 : i32
    return %c0_i32, %arg0 : i32, i32
  }
}

</mosaic_0001>

<bundles_post_ra>
// kernel: tpu_custom_call.1
= control target key start
LH: loop header
LB: loop body
LE: loop exit
PB: predicated region body
PF: predicated region fallthrough
CT: control target
= control target key end

     0   :  { %vm193_vm0 = vcmask 261120   ;;  %v1081_v4 = vmov 0   ;;  %s1492_s0 = inlined_call_operand.vmem [shape: f32[128,32], index: 0, kind: input, shape index: {}]   ;;  %s1493_s1 = inlined_call_operand.vmem [shape: f32[128,1], index: 1, kind: input, shape index: {}]   ;;  %s1494_s2 = inlined_call_operand.vmem [shape: bf16[32,64], index: 2, kind: input, shape index: {}]   ;;  %s1495_s3 = inlined_call_operand.vmem [shape: f32[1,64], index: 3, kind: input, shape index: {}]   ;;  %s1496_s4 = inlined_call_operand.vmem [shape: f32[1,64], index: 4, kind: input, shape index: {}]   ;;  %s1497_s5 = inlined_call_operand.vmem [shape: bf16[64,64], index: 5, kind: input, shape index: {}]   ;;  %s1498_s6 = inlined_call_operand.vmem [shape: f32[1,64], index: 6, kind: input, shape index: {}]   ;;  %s1499_s7 = inlined_call_operand.vmem [shape: bf16[3,64], index: 7, kind: input, shape index: {}]   ;;  %s1500_s8 = inlined_call_operand.vmem [shape: f32[3,1], index: 8, kind: input, shape index: {}]   ;;  %s1501_s9 = inlined_call_operand.hbm [shape: f32[3,128], index: 9, kind: output, shape index: {}]  }
   0x1   :  { %v923_v0 = vld [vmem:[%s1494_s2] sm:$0xff]   ;;  %v924_v1 = vld [vmem:[%s1494_s2 + $0x8] sm:$0xff]   ;;  %921 = vset.pattern.permute.xlu0 %v1081_v4  ;;  %v36_v6 = vld [vmem:[%s1492_s0 + $0x10] sm:$0xff]  ;;  %922 = vset.pattern.permute.xlu1 %v1081_v4 }
   0x2   :  { %853 = vmatprep.subr.bf16.mxu1 %v923_v0  ;;  %v34_v2 = vld [vmem:[%s1492_s0] sm:$0xff]  ;;  %v35_v3 = vld [vmem:[%s1492_s0 + $0x8] sm:$0xff]  ;;  %v37_v7 = vld [vmem:[%s1492_s0 + $0x18] sm:$0xff] }
   0x3   :  { %854 = vmatpush3.bf16.msra.mxu1 %v923_v0  ;;  %v50_v5 = vpack.c.bf16 %v35_v3, %v34_v2  ;;  %v38_v8 = vld [vmem:[%s1492_s0 + $0x20] sm:$0xff]  ;;  %v39_v9 = vld [vmem:[%s1492_s0 + $0x28] sm:$0xff]  ;;  %v51_v10 = vpack.c.bf16 %v37_v7, %v36_v6  ;;  %v64_v13 = vld [vmem:[%s1493_s1 + $0x10] sm:$0xff] }
   0x4   :  { %855 = vmatprep.subr.bf16.mxu1 %v924_v1  ;;  %v52_v11 = vpack.c.bf16 %v39_v9, %v38_v8  ;;  %v62_v12 = vld [vmem:[%s1493_s1] sm:$0xff]  ;;  %v63_v14 = vld [vmem:[%s1493_s1 + $0x8] sm:$0xff]  ;;  %91 = vperm.xlu1 %922, %v64_v13   ;;  %v65_v15 = vld [vmem:[%s1493_s1 + $0x18] sm:$0xff] }
   0x5   :  { %857 = vmatprep.mubr.msk.bf16.mxu1 %vm193_vm0, %v50_v5  ;;  %81 = vperm.xlu0 %921, %v62_v12   ;;  %v40_v16 = vld [vmem:[%s1492_s0 + $0x30] sm:$0xff]  ;;  %v41_v17 = vld [vmem:[%s1492_s0 + $0x38] sm:$0xff]  ;;  %v42_v18 = vld [vmem:[%s1492_s0 + $0x40] sm:$0xff] }
   0x6   :  { %v43_v19 = vld [vmem:[%s1492_s0 + $0x48] sm:$0xff]  ;;  %v66_v20 = vld [vmem:[%s1493_s1 + $0x20] sm:$0xff]  ;;  %v53_v22 = vpack.c.bf16 %v41_v17, %v40_v16 }
   0x7   :  { %856 = vmatpush3.bf16.msra.mxu1 %v924_v1  ;;  %v67_v21 = vld [vmem:[%s1493_s1 + $0x28] sm:$0xff]  ;;  %v54_v23 = vpack.c.bf16 %v43_v19, %v42_v18 }
   0x8   :  { %96 = vperm.xlu1 %922, %v65_v15  }
   0x9   :  { %86 = vperm.xlu0 %921, %v63_v14  }
   0xa   :  { %858 = vmatmul.mubr.msk.bf16.vlgmr.msra.gmra.mrb[0].mxu1 %vm193_vm0, %v51_v10 }
   0xb   :  { %861 = vmatprep.mubr.msk.bf16.mxu1 %vm193_vm0, %v52_v11 }
   0xd   :  { %101 = vperm.xlu0 %921, %v66_v20  }
   0xe   :  { %14 = vsyncpa [#allocation3], 0  ;;  %v68_v24 = vld [vmem:[%s1493_s1 + $0x30] sm:$0xff]  ;;  %106 = vperm.xlu1 %922, %v67_v21   ;;  %v69_v25 = vld [vmem:[%s1493_s1 + $0x38] sm:$0xff]  ;;  %vm481_vm1 = vcmask 523264   ;;  %vm1083_vm2 = vmmov 0  }
   0xf   :  { %v44_v26 = vld [vmem:[%s1492_s0 + $0x50] sm:$0xff]  ;;  %v45_v27 = vld [vmem:[%s1492_s0 + $0x58] sm:$0xff]  ;;  %v46_v28 = vld [vmem:[%s1492_s0 + $0x60] sm:$0xff]  ;;  %s1084_s21 = smov [#allocation2]  }
  0x10   :  { %v47_v29 = vld [vmem:[%s1492_s0 + $0x68] sm:$0xff]  ;;  %v70_v30 = vld [vmem:[%s1493_s1 + $0x40] sm:$0xff]  ;;  %v55_v31 = vpack.c.bf16 %v45_v27, %v44_v26  ;;  %v72_v34 = vld [vmem:[%s1493_s1 + $0x50] sm:$0xff]  ;;  %s788_s22 = sshll.u32 %s1084_s21, 4  ;;  %s789_s22 = int_to_ptr.vmem [resolvable:$true] %s788_s22 }
  0x11   :  { %111 = vperm.xlu0 %921, %v68_v24   ;;  %v71_v32 = vld [vmem:[%s1493_s1 + $0x48] sm:$0xff]  ;;  %v56_v33 = vpack.c.bf16 %v47_v29, %v46_v28  ;;  %v73_v35 = vld [vmem:[%s1493_s1 + $0x58] sm:$0xff]  ;;  %v48_v36 = vld [vmem:[%s1492_s0 + $0x70] sm:$0xff]  ;;  %s1057_s23 = scalar_lea.vmem %s789_s22, 64  ;;  %p1062_p1 = scmp.lt.s32.totalorder %s789_s22, %s789_s22 }
  0x12   :  { %862 = vmatmul.mubr.msk.bf16.gmra.mrb[4].mxu1 %vm193_vm0, %v53_v22  ;;  %116 = vperm.xlu1 %922, %v69_v25   ;;  %v49_v37 = vld [vmem:[%s1492_s0 + $0x78] sm:$0xff]  ;;  %v74_v38 = vld [vmem:[%s1493_s1 + $0x60] sm:$0xff]  ;;  %v75_v40 = vld [vmem:[%s1493_s1 + $0x68] sm:$0xff]  ;;  %p1058_p0 = scmp.ne.s32.totalorder %s789_s22, %s1057_s23  ;;  %p1063_p2 = scmp.lt.s32.totalorder %s1057_s23, %s1057_s23 }
  0x13   :  { %865 = vmatprep.mubr.msk.bf16.mxu1 %vm193_vm0, %v54_v23  ;;  %v57_v39 = vpack.c.bf16 %v49_v37, %v48_v36  ;;  %v76_v41 = vld [vmem:[%s1493_s1 + $0x70] sm:$0xff]  ;;  %v77_v42 = vld [vmem:[%s1493_s1 + $0x78] sm:$0xff]  ;;  %v708_v43 = vld [vmem:[%s1500_s8] sm:$0x7] }
  0x14   :  { %v925_v44 = vld [vmem:[%s1497_s5] sm:$0xff]   ;;  %v926_v45 = vld [vmem:[%s1497_s5 + $0x8] sm:$0xff]   ;;  %v927_v46 = vld [vmem:[%s1497_s5 + $0x10] sm:$0xff]   ;;  %p1064_p3 = por %p1063_p2, %p1062_p1 }
  0x15   :  { %121 = vperm.xlu0 %921, %v70_v30   ;;  %873 = vmatprep.subr.bf16.mxu1 %v925_v44  ;;  %v928_v47 = vld [vmem:[%s1497_s5 + $0x18] sm:$0xff]   ;;  %v1263_v54 = vld [vmem:[%s1495_s3] ss:$0 sm:$0xff] }
  0x16   :  { %126 = vperm.xlu1 %922, %v71_v32   ;;  %874 = vmatpush3.bf16.msra.mxu1 %v925_v44  ;;  %v1270_v60 = vld [vmem:[%s1496_s4] ss:$0 sm:$0xff]  ;;  %p1065_p4 = pnand %p1064_p3, %p1058_p0 }
  0x17   :  { %875 = vmatprep.subr.bf16.mxu1 %v926_v45 }
  0x19   :  { %131 = vperm.xlu0 %921, %v72_v34  }
  0x1a   :  { %866 = vmatmul.mubr.msk.bf16.gmra.mrb[8].mxu1 %vm193_vm0, %v55_v31  ;;  %136 = vperm.xlu1 %922, %v73_v35  }
  0x1b   :  { %869 = vmatprep.mubr.msk.bf16.mxu1 %vm193_vm0, %v56_v33  ;;  %876 = vmatpush3.bf16.msra.mxu1 %v926_v45 }
  0x1c   :  { %877 = vmatprep.subr.bf16.mxu1 %v927_v46 }
  0x1d   :  { %141 = vperm.xlu0 %921, %v74_v38  }
  0x1e   :  { %146 = vperm.xlu1 %922, %v75_v40  }
  0x1f   :  { %878 = vmatpush3.bf16.msra.mxu1 %v927_v46 }
  0x20   :  { %879 = vmatprep.subr.bf16.mxu1 %v928_v47 }
  0x21   :  { %151 = vperm.xlu0 %921, %v76_v41  }
  0x22   :  { %870 = vmatmul.mubr.msk.bf16.gmra.mrb[12].mxu1 %vm193_vm0, %v57_v39  ;;  %156 = vperm.xlu1 %922, %v77_v42  }
  0x23   :  { %880 = vmatpush3.bf16.msra.mxu1 %v928_v47 }
  0x25   :  { %711 = vperm.xlu0 %921, %v708_v43  }
  0x83   :  { %v92_v49 = vpop.permute.xlu1 %91 }
  0x84   :  { %v82_v48 = vpop.permute.xlu0 %81  ;;  %v167_v56 = vmul.f32 %v1263_v54, %v92_v49 }
  0x85   :  { %v165_v58 = vmul.f32 %v1263_v54, %v82_v48 }
  0x87   :  { %v97_v51 = vpop.permute.xlu1 %96 }
  0x88   :  { %v87_v50 = vpop.permute.xlu0 %86  ;;  %v168_v61 = vmul.f32 %v1263_v54, %v97_v51 }
  0x89   :  { %v166_v0 = vmul.f32 %v1263_v54, %v87_v50 }
  0x8c   :  { %v102_v52 = vpop.permute.xlu0 %101 }
  0x8d   :  { %v107_v53 = vpop.permute.xlu1 %106  ;;  %v169_v17 = vmul.f32 %v1263_v54, %v102_v52 }
  0x8e   :  { %v170_v26 = vmul.f32 %v1263_v54, %v107_v53 }
  0x90   :  { %v112_v55 = vpop.permute.xlu0 %111 }
  0x91   :  { %v117_v57 = vpop.permute.xlu1 %116  ;;  %v171_v14 = vmul.f32 %v1263_v54, %v112_v55 }
  0x92   :  { %v172_v22 = vmul.f32 %v1263_v54, %v117_v57 }
  0x94   :  { %v122_v1 = vpop.permute.xlu0 %121 }
  0x95   :  { %v127_v7 = vpop.permute.xlu1 %126  ;;  %v173_v44 = vmul.f32 %v1263_v54, %v122_v1 }
  0x96   :  { %v174_v53 = vmul.f32 %v1263_v54, %v127_v7 }
  0x98   :  { %v132_v18 = vpop.permute.xlu0 %131 }
  0x99   :  { %v137_v27 = vpop.permute.xlu1 %136  ;;  %v175_v41 = vmul.f32 %v1263_v54, %v132_v18 }
  0x9a   :  { %v176_v49 = vmul.f32 %v1263_v54, %v137_v27 }
  0x9c   :  { %v142_v38 = vpop.permute.xlu0 %141 }
  0x9d   :  { %v147_v45 = vpop.permute.xlu1 %146 }
  0xdd   :  { %v859_v59 = vpop.f32.mrb[0].mxu1 }
  0xde   :  { %v261_v62 = vadd.f32 %v859_v59, %v167_v56  ;;  %v252_v63 = vpop.f32.mrb[1].mxu1 }
  0xdf   :  { %v253_v2 = vadd.f32 %v252_v63, %v165_v58  ;;  %v860_v3 = vpop.f32.mrb[2].mxu1 }
  0xe0   :  { %v1275_v4 = vadd.f32 %v1270_v60, %v261_v62  ;;  %v264_v5 = vadd.f32 %v860_v3, %v168_v61  ;;  %v255_v6 = vpop.f32.mrb[3].mxu1 }
  0xe1   :  { %v1278_v8 = vadd.f32 %v1270_v60, %v253_v2  ;;  %v256_v9 = vadd.f32 %v255_v6, %v166_v0  ;;  %v152_v0 = vpop.permute.xlu0 %151 }
  0xe2   :  { %v340_v10 = vsub.f32 0.0, %v1275_v4  ;;  %v1282_v11 = vadd.f32 %v1270_v60, %v264_v5  ;;  %v179_v6 = vmul.f32 %v1263_v54, %v152_v0 }
  0xe3   :  { %v338_v12 = vsub.f32 0.0, %v1278_v8  ;;  %v1286_v13 = vadd.f32 %v1270_v60, %v256_v9 }
  0xe4   :  { %v358_v15 = vmul.f32 1.442695, %v340_v10  ;;  %v341_v16 = vsub.f32 0.0, %v1282_v11 }
  0xe5   :  { %v354_v19 = vmul.f32 1.442695, %v338_v12  ;;  %v339_v20 = vsub.f32 0.0, %v1286_v13  ;;  %v863_v21 = vpop.f32.mrb[4].mxu1 }
  0xe6   :  { %929 = vpow2.f32 %v358_v15  ;;  %v360_v23 = vmul.f32 1.442695, %v341_v16  ;;  %v277_v24 = vadd.f32 %v863_v21, %v171_v14  ;;  %v268_v25 = vpop.f32.mrb[5].mxu1  ;;  %v157_v14 = vpop.permute.xlu1 %156  ;;  %v177_v21 = vmul.f32 %v1263_v54, %v142_v38 }
  0xe7   :  { %931 = vpow2.f32 %v354_v19  ;;  %v356_v28 = vmul.f32 1.442695, %v339_v20  ;;  %v269_v29 = vadd.f32 %v268_v25, %v169_v17  ;;  %v864_v30 = vpop.f32.mrb[6].mxu1  ;;  %v180_v25 = vmul.f32 %v1263_v54, %v157_v14 }
  0xe8   :  { %933 = vpow2.f32 %v360_v23  ;;  %v1295_v31 = vadd.f32 %v1270_v60, %v277_v24  ;;  %v280_v32 = vadd.f32 %v864_v30, %v172_v22  ;;  %v271_v33 = vpop.f32.mrb[7].mxu1 }
  0xe9   :  { %935 = vpow2.f32 %v356_v28  ;;  %v1298_v34 = vadd.f32 %v1270_v60, %v269_v29  ;;  %v272_v35 = vadd.f32 %v271_v33, %v170_v26  ;;  %v178_v29 = vmul.f32 %v1263_v54, %v147_v45 }
  0xea   :  { %v344_v36 = vsub.f32 0.0, %v1295_v31  ;;  %v1302_v37 = vadd.f32 %v1270_v60, %v280_v32 }
  0xeb   :  { %v342_v39 = vsub.f32 0.0, %v1298_v34  ;;  %v1306_v40 = vadd.f32 %v1270_v60, %v272_v35 }
  0xec   :  { %v366_v42 = vmul.f32 1.442695, %v344_v36  ;;  %v345_v43 = vsub.f32 0.0, %v1302_v37 }
  0xed   :  { %v362_v46 = vmul.f32 1.442695, %v342_v39  ;;  %v343_v47 = vsub.f32 0.0, %v1306_v40  ;;  %v867_v48 = vpop.f32.mrb[8].mxu1 }
  0xee   :  { %937 = vpow2.f32 %v366_v42  ;;  %v368_v50 = vmul.f32 1.442695, %v345_v43  ;;  %v293_v51 = vadd.f32 %v867_v48, %v175_v41  ;;  %v284_v52 = vpop.f32.mrb[9].mxu1 }
  0xef   :  { %939 = vpow2.f32 %v362_v46  ;;  %v364_v55 = vmul.f32 1.442695, %v343_v47  ;;  %v285_v56 = vadd.f32 %v284_v52, %v173_v44  ;;  %v868_v57 = vpop.f32.mrb[10].mxu1 }
  0xf0   :  { %v930_v58 = vpop.eup %929  ;;  %941 = vpow2.f32 %v368_v50  ;;  %v1315_v59 = vadd.f32 %v1270_v60, %v293_v51  ;;  %v296_v61 = vadd.f32 %v868_v57, %v176_v49  ;;  %v287_v62 = vpop.f32.mrb[11].mxu1 }
  0xf1   :  { %v932_v63 = vpop.eup %931  ;;  %v388_v1 = vadd.f32 1.0, %v930_v58  ;;  %943 = vpow2.f32 %v364_v55  ;;  %v1318_v2 = vadd.f32 %v1270_v60, %v285_v56  ;;  %v288_v3 = vadd.f32 %v287_v62, %v174_v53 }
  0xf2   :  { %v934_v5 = vpop.eup %933  ;;  %v386_v7 = vadd.f32 1.0, %v932_v63  ;;  %v348_v9 = vsub.f32 0.0, %v1315_v59  ;;  %v1323_v10 = vadd.f32 %v1270_v60, %v296_v61 }
  0xf3   :  { %v936_v12 = vpop.eup %935  ;;  %945 = vrcp.f32 %v388_v1  ;;  %v389_v15 = vadd.f32 1.0, %v934_v5  ;;  %v346_v16 = vsub.f32 0.0, %v1318_v2  ;;  %v1327_v17 = vadd.f32 %v1270_v60, %v288_v3 }
  0xf4   :  { %947 = vrcp.f32 %v386_v7  ;;  %v387_v18 = vadd.f32 1.0, %v936_v12  ;;  %v374_v19 = vmul.f32 1.442695, %v348_v9  ;;  %v349_v20 = vsub.f32 0.0, %v1323_v10 }
  0xf5   :  { %949 = vrcp.f32 %v389_v15  ;;  %v370_v22 = vmul.f32 1.442695, %v346_v16  ;;  %v347_v23 = vsub.f32 0.0, %v1327_v17  ;;  %v871_v24 = vpop.f32.mrb[12].mxu1 }
  0xf6   :  { %951 = vrcp.f32 %v387_v18  ;;  %v376_v26 = vmul.f32 1.442695, %v349_v20  ;;  %v309_v27 = vadd.f32 %v871_v24, %v179_v6  ;;  %v300_v28 = vpop.f32.mrb[13].mxu1 }
  0xf7   :  { %953 = vpow2.f32 %v374_v19  ;;  %v372_v30 = vmul.f32 1.442695, %v347_v23  ;;  %v301_v32 = vadd.f32 %v300_v28, %v177_v21  ;;  %v872_v33 = vpop.f32.mrb[14].mxu1 }
  0xf8   :  { %v938_v35 = vpop.eup %937  ;;  %955 = vpow2.f32 %v370_v22  ;;  %v1335_v36 = vadd.f32 %v1270_v60, %v309_v27  ;;  %v312_v38 = vadd.f32 %v872_v33, %v180_v25  ;;  %v303_v39 = vpop.f32.mrb[15].mxu1 }
  0xf9   :  { %v940_v41 = vpop.eup %939  ;;  %v392_v42 = vadd.f32 1.0, %v938_v35  ;;  %957 = vpow2.f32 %v376_v26  ;;  %v1338_v43 = vadd.f32 %v1270_v60, %v301_v32  ;;  %v304_v44 = vadd.f32 %v303_v39, %v178_v29 }
  0xfa   :  { %v942_v46 = vpop.eup %941  ;;  %v390_v54 = vadd.f32 1.0, %v940_v41  ;;  %959 = vpow2.f32 %v372_v30  ;;  %v352_v45 = vsub.f32 0.0, %v1335_v36  ;;  %v1342_v47 = vadd.f32 %v1270_v60, %v312_v38 }
  0xfb   :  { %v944_v48 = vpop.eup %943  ;;  %961 = vrcp.f32 %v392_v42  ;;  %v393_v49 = vadd.f32 1.0, %v942_v46  ;;  %v350_v50 = vsub.f32 0.0, %v1338_v43  ;;  %v1346_v51 = vadd.f32 %v1270_v60, %v304_v44 }
  0xfc   :  { %963 = vrcp.f32 %v390_v54  ;;  %v391_v52 = vadd.f32 1.0, %v944_v48  ;;  %v382_v53 = vmul.f32 1.442695, %v352_v45  ;;  %v353_v55 = vsub.f32 0.0, %v1342_v47 }
  0xfd   :  { %v946_v56 = vpop.eup %945  ;;  %965 = vrcp.f32 %v393_v49  ;;  %v378_v57 = vmul.f32 1.442695, %v350_v50  ;;  %v351_v58 = vsub.f32 0.0, %v1346_v51 }
  0xfe   :  { %v948_v61 = vpop.eup %947  ;;  %967 = vrcp.f32 %v391_v52  ;;  %v384_v62 = vmul.f32 1.442695, %v353_v55  ;;  %v420_v60 = vmul.f32 %v946_v56, %v1275_v4  ;;  %v1082_v56 = vmov 0.0  }
  0xff   :  { %v950_v63 = vpop.eup %949  ;;  %969 = vpow2.f32 %v382_v53  ;;  %v380_v0 = vmul.f32 1.442695, %v351_v58  ;;  %v418_v6 = vmul.f32 %v948_v61, %v1278_v8  ;;  %897 = vmatprep.subr.bf16.mxu0 %v1082_v56  ;;  %913 = vmatprep.mubr.msk.bf16.mxu0 %vm1083_vm2, %v1082_v56 }
 0x100   :  { %v952_v1 = vpop.eup %951  ;;  %v421_v3 = vmul.f32 %v950_v63, %v1282_v11  ;;  %971 = vpow2.f32 %v378_v57 }
 0x101   :  { %v954_v5 = vpop.eup %953  ;;  %v419_v7 = vmul.f32 %v952_v1, %v1286_v13  ;;  %973 = vpow2.f32 %v384_v62 }
 0x102   :  { %v956_v9 = vpop.eup %955  ;;  %v435_v12 = vpack.c.bf16 %v421_v3, %v420_v60  ;;  %v396_v14 = vadd.f32 1.0, %v954_v5  ;;  %975 = vpow2.f32 %v380_v0 }
 0x103   :  { %v958_v15 = vpop.eup %957  ;;  %v434_v16 = vpack.c.bf16 %v419_v7, %v418_v6  ;;  %v394_v18 = vadd.f32 1.0, %v956_v9 }
 0x104   :  { %v960_v19 = vpop.eup %959  ;;  %977 = vrcp.f32 %v396_v14  ;;  %v397_v4 = vadd.f32 1.0, %v958_v15 }
 0x105   :  { %v962_v20 = vpop.eup %961  ;;  %979 = vrcp.f32 %v394_v18  ;;  %v395_v11 = vadd.f32 1.0, %v960_v19  ;;  %881 = vmatprep.mubr.msk.bf16.mxu1 %vm481_vm1, %v434_v16 }
 0x106   :  { %v964_v8 = vpop.eup %963  ;;  %981 = vrcp.f32 %v397_v4  ;;  %882 = vmatmul.mubr.msk.bf16.vlgmr.msra.gmra.mrb[16].mxu1 %vm481_vm1, %v435_v12  ;;  %v424_v22 = vmul.f32 %v962_v20, %v1295_v31 }
 0x107   :  { %v966_v13 = vpop.eup %965  ;;  %983 = vrcp.f32 %v395_v11  ;;  %v422_v25 = vmul.f32 %v964_v8, %v1298_v34 }
 0x108   :  { %v968_v21 = vpop.eup %967  ;;  %v425_v23 = vmul.f32 %v966_v13, %v1302_v37 }
 0x109   :  { %v970_v24 = vpop.eup %969  ;;  %v423_v26 = vmul.f32 %v968_v21, %v1306_v40 }
 0x10a   :  { %v972_v27 = vpop.eup %971  ;;  %v437_v28 = vpack.c.bf16 %v425_v23, %v424_v22  ;;  %v400_v29 = vadd.f32 1.0, %v970_v24 }
 0x10b   :  { %v974_v30 = vpop.eup %973  ;;  %v436_v32 = vpack.c.bf16 %v423_v26, %v422_v25  ;;  %v398_v33 = vadd.f32 1.0, %v972_v27 }
 0x10c   :  { %v976_v35 = vpop.eup %975  ;;  %985 = vrcp.f32 %v400_v29  ;;  %v401_v38 = vadd.f32 1.0, %v974_v30 }
 0x10d   :  { %987 = vrcp.f32 %v398_v33  ;;  %v399_v39 = vadd.f32 1.0, %v976_v35  ;;  %885 = vmatprep.mubr.msk.bf16.mxu1 %vm481_vm1, %v436_v32 }
 0x10e   :  { %v978_v31 = vpop.eup %977  ;;  %989 = vrcp.f32 %v401_v38  ;;  %886 = vmatmul.mubr.msk.bf16.gmra.mrb[20].mxu1 %vm481_vm1, %v437_v28 }
 0x10f   :  { %v980_v34 = vpop.eup %979  ;;  %991 = vrcp.f32 %v399_v39  ;;  %v428_v41 = vmul.f32 %v978_v31, %v1315_v59 }
 0x110   :  { %v982_v37 = vpop.eup %981  ;;  %v426_v44 = vmul.f32 %v980_v34, %v1318_v2 }
 0x111   :  { %v984_v40 = vpop.eup %983  ;;  %v429_v42 = vmul.f32 %v982_v37, %v1323_v10 }
 0x112   :  { %v427_v46 = vmul.f32 %v984_v40, %v1327_v17 }
 0x113   :  { %v439_v54 = vpack.c.bf16 %v429_v42, %v428_v41 }
 0x114   :  { %v438_v45 = vpack.c.bf16 %v427_v46, %v426_v44 }
 0x116   :  { %v986_v48 = vpop.eup %985  ;;  %889 = vmatprep.mubr.msk.bf16.mxu1 %vm481_vm1, %v438_v45 }
 0x117   :  { %v988_v49 = vpop.eup %987  ;;  %890 = vmatmul.mubr.msk.bf16.gmra.mrb[24].mxu1 %vm481_vm1, %v439_v54  ;;  %v432_v53 = vmul.f32 %v986_v48, %v1335_v36  ;;  %v1379_v36 = vld [vmem:[%s1498_s6] ss:$0 sm:$0xff] }
 0x118   :  { %v990_v50 = vpop.eup %989  ;;  %v430_v10 = vmul.f32 %v988_v49, %v1338_v43 }
 0x119   :  { %v992_v52 = vpop.eup %991  ;;  %v433_v59 = vmul.f32 %v990_v50, %v1342_v47 }
 0x11a   :  { %v431_v2 = vmul.f32 %v992_v52, %v1346_v51 }
 0x11b   :  { %v441_v55 = vpack.c.bf16 %v433_v59, %v432_v53 }
 0x11c   :  { %v440_v17 = vpack.c.bf16 %v431_v2, %v430_v10 }
 0x11e   :  { %893 = vmatprep.mubr.msk.bf16.mxu1 %vm481_vm1, %v440_v17 }
 0x11f   :  { %894 = vmatmul.mubr.msk.bf16.gmra.mrb[28].mxu1 %vm481_vm1, %v441_v55 }
 0x1d9   :  { %v883_v43 = vpop.f32.mrb[16].mxu1 }
 0x1da   :  { %v1382_v47 = vadd.f32 %v883_v43, %v1379_v36  ;;  %v540_v51 = vpop.f32.mrb[17].mxu1 }
 0x1db   :  { %v1385_v57 = vadd.f32 %v1379_v36, %v540_v51  ;;  %v884_v58 = vpop.f32.mrb[18].mxu1 }
 0x1dc   :  { %v605_v61 = vsub.f32 0.0, %v1382_v47  ;;  %v1389_v62 = vadd.f32 %v884_v58, %v1379_v36  ;;  %v543_v63 = vpop.f32.mrb[19].mxu1 }
 0x1dd   :  { %v603_v0 = vsub.f32 0.0, %v1385_v57  ;;  %v1393_v1 = vadd.f32 %v1379_v36, %v543_v63 }
 0x1de   :  { %v623_v60 = vmul.f32 1.442695, %v605_v61  ;;  %v606_v3 = vsub.f32 0.0, %v1389_v62 }
 0x1df   :  { %v619_v5 = vmul.f32 1.442695, %v603_v0  ;;  %v604_v6 = vsub.f32 0.0, %v1393_v1 }
 0x1e0   :  { %993 = vpow2.f32 %v623_v60  ;;  %v625_v7 = vmul.f32 1.442695, %v606_v3 }
 0x1e1   :  { %995 = vpow2.f32 %v619_v5  ;;  %v621_v9 = vmul.f32 1.442695, %v604_v6  ;;  %v887_v12 = vpop.f32.mrb[20].mxu1 }
 0x1e2   :  { %997 = vpow2.f32 %v625_v7  ;;  %v1398_v14 = vadd.f32 %v887_v12, %v1379_v36  ;;  %v556_v15 = vpop.f32.mrb[21].mxu1 }
 0x1e3   :  { %999 = vpow2.f32 %v621_v9  ;;  %v1401_v16 = vadd.f32 %v1379_v36, %v556_v15  ;;  %v888_v18 = vpop.f32.mrb[22].mxu1 }
 0x1e4   :  { %v609_v19 = vsub.f32 0.0, %v1398_v14  ;;  %v1405_v4 = vadd.f32 %v888_v18, %v1379_v36  ;;  %v559_v20 = vpop.f32.mrb[23].mxu1 }
 0x1e5   :  { %v607_v11 = vsub.f32 0.0, %v1401_v16  ;;  %v1409_v8 = vadd.f32 %v1379_v36, %v559_v20 }
 0x1e6   :  { %v631_v13 = vmul.f32 1.442695, %v609_v19  ;;  %v610_v21 = vsub.f32 0.0, %v1405_v4 }
 0x1e7   :  { %v627_v22 = vmul.f32 1.442695, %v607_v11  ;;  %v608_v23 = vsub.f32 0.0, %v1409_v8 }
 0x1e8   :  { %1001 = vpow2.f32 %v631_v13  ;;  %v633_v24 = vmul.f32 1.442695, %v610_v21 }
 0x1e9   :  { %1003 = vpow2.f32 %v627_v22  ;;  %v629_v25 = vmul.f32 1.442695, %v608_v23 }
 0x1ea   :  { %v994_v26 = vpop.eup %993  ;;  %1005 = vpow2.f32 %v633_v24  ;;  %v891_v27 = vpop.f32.mrb[24].mxu1 }
 0x1eb   :  { %v996_v28 = vpop.eup %995  ;;  %v653_v29 = vadd.f32 1.0, %v994_v26  ;;  %1007 = vpow2.f32 %v629_v25  ;;  %v1414_v30 = vadd.f32 %v891_v27, %v1379_v36  ;;  %v572_v32 = vpop.f32.mrb[25].mxu1 }
 0x1ec   :  { %v998_v33 = vpop.eup %997  ;;  %v651_v35 = vadd.f32 1.0, %v996_v28  ;;  %v1417_v38 = vadd.f32 %v1379_v36, %v572_v32  ;;  %v892_v39 = vpop.f32.mrb[26].mxu1 }
 0x1ed   :  { %v1000_v31 = vpop.eup %999  ;;  %1009 = vrcp.f32 %v653_v29  ;;  %v654_v34 = vadd.f32 1.0, %v998_v33  ;;  %v613_v37 = vsub.f32 0.0, %v1414_v30  ;;  %v1421_v40 = vadd.f32 %v892_v39, %v1379_v36  ;;  %v575_v41 = vpop.f32.mrb[27].mxu1 }
 0x1ee   :  { %1011 = vrcp.f32 %v651_v35  ;;  %v652_v42 = vadd.f32 1.0, %v1000_v31  ;;  %v611_v44 = vsub.f32 0.0, %v1417_v38  ;;  %v1425_v46 = vadd.f32 %v1379_v36, %v575_v41 }
 0x1ef   :  { %1013 = vrcp.f32 %v654_v34  ;;  %v639_v54 = vmul.f32 1.442695, %v613_v37  ;;  %v614_v45 = vsub.f32 0.0, %v1421_v40 }
 0x1f0   :  { %1015 = vrcp.f32 %v652_v42  ;;  %v635_v48 = vmul.f32 1.442695, %v611_v44  ;;  %v612_v49 = vsub.f32 0.0, %v1425_v46 }
 0x1f1   :  { %1017 = vpow2.f32 %v639_v54  ;;  %v641_v50 = vmul.f32 1.442695, %v614_v45 }
 0x1f2   :  { %v1002_v52 = vpop.eup %1001  ;;  %1019 = vpow2.f32 %v635_v48  ;;  %v637_v53 = vmul.f32 1.442695, %v612_v49  ;;  %v895_v59 = vpop.f32.mrb[28].mxu1 }
 0x1f3   :  { %v1004_v10 = vpop.eup %1003  ;;  %v657_v2 = vadd.f32 1.0, %v1002_v52  ;;  %1021 = vpow2.f32 %v641_v50  ;;  %v1430_v55 = vadd.f32 %v895_v59, %v1379_v36  ;;  %v588_v17 = vpop.f32.mrb[29].mxu1 }
 0x1f4   :  { %v1006_v43 = vpop.eup %1005  ;;  %v655_v51 = vadd.f32 1.0, %v1004_v10  ;;  %1023 = vpow2.f32 %v637_v53  ;;  %v1433_v58 = vadd.f32 %v1379_v36, %v588_v17  ;;  %v896_v61 = vpop.f32.mrb[30].mxu1 }
 0x1f5   :  { %v1008_v63 = vpop.eup %1007  ;;  %1025 = vrcp.f32 %v657_v2  ;;  %v658_v0 = vadd.f32 1.0, %v1006_v43  ;;  %v617_v60 = vsub.f32 0.0, %v1430_v55  ;;  %v1437_v3 = vadd.f32 %v896_v61, %v1379_v36  ;;  %v591_v5 = vpop.f32.mrb[31].mxu1 }
 0x1f6   :  { %1027 = vrcp.f32 %v655_v51  ;;  %v656_v6 = vadd.f32 1.0, %v1008_v63  ;;  %v615_v7 = vsub.f32 0.0, %v1433_v58  ;;  %v1441_v9 = vadd.f32 %v1379_v36, %v591_v5 }
 0x1f7   :  { %v1010_v12 = vpop.eup %1009  ;;  %1029 = vrcp.f32 %v658_v0  ;;  %v647_v15 = vmul.f32 1.442695, %v617_v60  ;;  %v618_v18 = vsub.f32 0.0, %v1437_v3 }
 0x1f8   :  { %v1012_v19 = vpop.eup %1011  ;;  %1031 = vrcp.f32 %v656_v6  ;;  %v643_v20 = vmul.f32 1.442695, %v615_v7  ;;  %v616_v11 = vsub.f32 0.0, %v1441_v9  ;;  %v685_v23 = vmul.f32 %v1010_v12, %v1382_v47 }
 0x1f9   :  { %v1014_v13 = vpop.eup %1013  ;;  %1033 = vpow2.f32 %v647_v15  ;;  %v649_v21 = vmul.f32 1.442695, %v618_v18  ;;  %v683_v26 = vmul.f32 %v1012_v19, %v1385_v57 }
 0x1fa   :  { %v1016_v22 = vpop.eup %1015  ;;  %v686_v24 = vmul.f32 %v1014_v13, %v1389_v62  ;;  %1035 = vpow2.f32 %v643_v20  ;;  %v645_v36 = vmul.f32 1.442695, %v616_v11 }
 0x1fb   :  { %v1018_v25 = vpop.eup %1017  ;;  %v684_v27 = vmul.f32 %v1016_v22, %v1393_v1  ;;  %1037 = vpow2.f32 %v649_v21  ;;  %v712_v22 = vpop.permute.xlu0 %711 }
 0x1fc   :  { %v1020_v28 = vpop.eup %1019  ;;  %v661_v29 = vadd.f32 1.0, %v1018_v25  ;;  %1039 = vpow2.f32 %v645_v36  ;;  %v701_v32 = vpack.c.bf16 %v686_v24, %v685_v23 }
 0x1fd   :  { %v1022_v33 = vpop.eup %1021  ;;  %v659_v35 = vadd.f32 1.0, %v1020_v28  ;;  %v700_v39 = vpack.c.bf16 %v684_v27, %v683_v26 }
 0x1fe   :  { %v1024_v31 = vpop.eup %1023  ;;  %1041 = vrcp.f32 %v661_v29  ;;  %v662_v47 = vadd.f32 1.0, %v1022_v33 }
 0x1ff   :  { %v1026_v34 = vpop.eup %1025  ;;  %1043 = vrcp.f32 %v659_v35  ;;  %v660_v62 = vadd.f32 1.0, %v1024_v31  ;;  %v718_v37 = vsel %vm481_vm1, %v700_v39, 0 }
 0x200   :  { %v1028_v41 = vpop.eup %1027  ;;  %1045 = vrcp.f32 %v662_v47  ;;  %898 = vmatpush3.bf16.xpose.msra.mxu0 %v718_v37  ;;  %v689_v42 = vmul.f32 %v1026_v34, %v1398_v14  ;;  %v721_v14 = vsel %vm481_vm1, %v701_v32, 0 }
 0x201   :  { %v1030_v57 = vpop.eup %1029  ;;  %1047 = vrcp.f32 %v660_v62  ;;  %899 = vmatprep.subr.bf16.mxu0 %v1082_v56  ;;  %v687_v45 = vmul.f32 %v1028_v41, %v1401_v16 }
 0x202   :  { %v1032_v1 = vpop.eup %1031  ;;  %v690_v44 = vmul.f32 %v1030_v57, %v1405_v4 }
 0x203   :  { %v1034_v54 = vpop.eup %1033  ;;  %v688_v48 = vmul.f32 %v1032_v1, %v1409_v8 }
 0x204   :  { %v1036_v49 = vpop.eup %1035  ;;  %v665_v50 = vadd.f32 1.0, %v1034_v54  ;;  %v703_v52 = vpack.c.bf16 %v690_v44, %v689_v42 }
 0x205   :  { %v1038_v53 = vpop.eup %1037  ;;  %v663_v59 = vadd.f32 1.0, %v1036_v49  ;;  %v702_v10 = vpack.c.bf16 %v688_v48, %v687_v45 }
 0x206   :  { %v1040_v2 = vpop.eup %1039  ;;  %1049 = vrcp.f32 %v665_v50  ;;  %v666_v17 = vadd.f32 1.0, %v1038_v53  ;;  %v727_v13 = vsel %vm481_vm1, %v703_v52, 0 }
 0x207   :  { %1051 = vrcp.f32 %v663_v59  ;;  %v664_v43 = vadd.f32 1.0, %v1040_v2  ;;  %v724_v7 = vsel %vm481_vm1, %v702_v10, 0 }
 0x208   :  { %v1042_v51 = vpop.eup %1041  ;;  %1053 = vrcp.f32 %v666_v17  ;;  %900 = vmatpush3.bf16.xpose.msra.mxu0 %v721_v14 }
 0x209   :  { %v1044_v4 = vpop.eup %1043  ;;  %1055 = vrcp.f32 %v664_v43  ;;  %901 = vmatprep.subr.bf16.mxu0 %v1082_v56  ;;  %v693_v61 = vmul.f32 %v1042_v51, %v1414_v30 }
 0x20a   :  { %v1046_v16 = vpop.eup %1045  ;;  %v691_v0 = vmul.f32 %v1044_v4, %v1417_v38 }
 0x20b   :  { %v1048_v8 = vpop.eup %1047  ;;  %v694_v63 = vmul.f32 %v1046_v16, %v1421_v40 }
 0x20c   :  { %v692_v60 = vmul.f32 %v1048_v8, %v1425_v46 }
 0x20d   :  { %v705_v5 = vpack.c.bf16 %v694_v63, %v693_v61 }
 0x20e   :  { %v704_v6 = vpack.c.bf16 %v692_v60, %v691_v0 }
 0x210   :  { %v1050_v12 = vpop.eup %1049  ;;  %902 = vmatpush3.bf16.xpose.msra.mxu0 %v724_v7  ;;  %v730_v21 = vsel %vm481_vm1, %v704_v6, 0 }
 0x211   :  { %v1052_v15 = vpop.eup %1051  ;;  %903 = vmatprep.subr.bf16.mxu0 %v1082_v56  ;;  %v697_v20 = vmul.f32 %v1050_v12, %v1430_v55  ;;  %v733_v55 = vsel %vm481_vm1, %v705_v5, 0 }
 0x212   :  { %v1054_v18 = vpop.eup %1053  ;;  %v695_v40 = vmul.f32 %v1052_v15, %v1433_v58 }
 0x213   :  { %v1056_v19 = vpop.eup %1055  ;;  %v698_v30 = vmul.f32 %v1054_v18, %v1437_v3 }
 0x214   :  { %v696_v38 = vmul.f32 %v1056_v19, %v1441_v9  ;;  %v699_v9 = vld [vmem:[%s1499_s7] sm:$0x3] }
 0x215   :  { %v707_v46 = vpack.c.bf16 %v698_v30, %v697_v20 }
 0x216   :  { %v706_v11 = vpack.c.bf16 %v696_v38, %v695_v40 }
 0x217   :  { %v739_v3 = vsel %vm481_vm1, %v707_v46, 0 }
 0x218   :  { %904 = vmatpush3.bf16.xpose.msra.mxu0 %v727_v13  ;;  %v736_v58 = vsel %vm481_vm1, %v706_v11, 0 }
 0x219   :  { %905 = vmatprep.subr.bf16.mxu0 %v1082_v56 }
 0x220   :  { %906 = vmatpush3.bf16.xpose.msra.mxu0 %v730_v21 }
 0x221   :  { %907 = vmatprep.subr.bf16.mxu0 %v1082_v56 }
 0x228   :  { %908 = vmatpush3.bf16.xpose.msra.mxu0 %v733_v55 }
 0x229   :  { %909 = vmatprep.subr.bf16.mxu0 %v1082_v56 }
 0x230   :  { %910 = vmatpush3.bf16.xpose.msra.mxu0 %v736_v58 }
 0x231   :  { %911 = vmatprep.subr.bf16.mxu0 %v1082_v56 }
 0x238   :  { %912 = vmatpush3.bf16.xpose.msra.mxu0 %v739_v3 }
 0x23f   :  { %914 = vmatmul.mubr.msk.bf16.vlgmr.msra.gmra.mrb[0].mxu0 %vm481_vm1, %v699_v9 }
 0x312   :  { %v775_v23 = vpop.f32.mrb[0].mxu0 }
 0x313   :  { %v776_v24 = vadd.f32 %v775_v23, %v712_v22  ;;  %v915_v36 = vpop.f32.mrb[1].mxu0 }
 0x314   :  { %v778_v25 = vpop.f32.mrb[2].mxu0 }
 0x315   :  { %781 = vst [vmem:[#allocation2] sm:$0x7] %v776_v24  ;;  %v916_v26 = vpop.f32.mrb[3].mxu0 }
 0x316   :  { %1068 = shalt.err (!%p1065_p4)
}
 0x317   :  { %s1069_s25 = scalar_lea.hbm %s1501_s9, 64 }
 0x318   :  { %p1070_p5 = scmp.ne.s32.totalorder %s1501_s9, %s1069_s25  ;;  %p1073_p6 = scmp.lt.u32.totalorder %s1069_s25, %s1501_s9 }
 0x31a   :  { %p1075_p7 = pnand %p1073_p6, %p1070_p5 }
 0x31c   :  { %1078 = shalt.err (!%p1075_p7)
}
 0x31d   :  { %791 = dma.vmem_to_hbm [thread:$0]  %s789_s22, 64, %s1501_s9, [#allocation3]  }
 0x31e   :  { %1079 = dma.done.wait [#allocation3], 64  }
 0x31f   :  { %1080 = vsyncadd [#allocation3], 4294967232 }
 0x320   :  { %795 = vsyncpa [#allocation3], 1 }

</bundles_post_ra>
